<compile_context>
chip_gen: v5e
topology: v5e:2x2
jax: 0.10.0
libtpu: 0.0.40
codegen_flags: <defaults>
</compile_context>

<pallas_src>
import functools

import jax
import jax.numpy as jnp
from jax.experimental import pallas as pl
from jax.experimental.pallas import tpu as pltpu

# CartPole-like sizes consistent with the module's __init__:
OBS_DIM = 4        # env.observation_space.shape[0]
HIDDEN = 128       # self.hidden_size
ACTION_DIM = 2     # env.action_space.n (Discrete)

# Packed parameter slab row layout: [w1 (OBS_DIM rows) | b1 | w2^T (ACTION_DIM rows) | b2]
_B1_ROW = OBS_DIM
_W2_ROW0 = OBS_DIM + 1
_B2_ROW = OBS_DIM + 1 + ACTION_DIM
_N_PARAM_ROWS = OBS_DIM + 1 + ACTION_DIM + 1   # = 8 -> exactly one f32 vreg


def policy_kernel(state_ref, params_ref, out_ref):
    # state_ref: [B, OBS_DIM] f32, params_ref: [_N_PARAM_ROWS, HIDDEN] f32
    # out_ref:   [B, ACTION_DIM] f32
    s = state_ref[...]
    p = params_ref[...]

    # ---- affine1 + ReLU on the VPU --------------------------------------
    # h = b1 + sum_k s[:, k] * w1[k, :]   (OBS_DIM scalar-broadcast mul/adds;
    # avoids pushing an M<=B, K=4 matmul through the MXU)
    h = p[_B1_ROW:_B1_ROW + 1, :]                      # [1, HIDDEN]
    for k in range(OBS_DIM):
        h = h + s[:, k:k + 1] * p[k:k + 1, :]          # [B, HIDDEN]
    h = jnp.maximum(h, 0.0)

    # ---- action_head with lane-dense w2^T rows ([ACTION_DIM, HIDDEN]) ----
    # logit_a = <h, w2^T[a]>  (elementwise multiply + lane reduction; no MXU)
    cols = []
    for a in range(ACTION_DIM):
        w_row = p[_W2_ROW0 + a:_W2_ROW0 + a + 1, :]    # [1, HIDDEN]
        cols.append(jnp.sum(h * w_row, axis=-1, keepdims=True))   # [B, 1]
    logits = jnp.concatenate(cols, axis=-1)            # [B, ACTION_DIM]
    logits = logits + p[_B2_ROW:_B2_ROW + 1, :ACTION_DIM]

    # ---- softmax over the ACTION axis (last axis) ------------------------
    m = jnp.max(logits, axis=-1, keepdims=True)
    e = jnp.exp(logits - m)
    denom = jnp.sum(e, axis=-1, keepdims=True)
    out_ref[...] = e * pl.reciprocal(denom, approx=False)


def pack_params(w1, b1, w2, b2):
    """Pack (w1 [OBS,H], b1 [H], w2 [H,A], b2 [A]) into one [OBS+1+A+1, H] f32 slab."""
    w2_t = jnp.transpose(w2)                                      # [ACTION_DIM, HIDDEN]
    b2_row = jnp.zeros((1, HIDDEN), jnp.float32).at[0, :ACTION_DIM].set(b2)
    slab = jnp.concatenate(
        [w1.astype(jnp.float32),
         b1.reshape(1, HIDDEN).astype(jnp.float32),
         w2_t.astype(jnp.float32),
         b2_row],
        axis=0,
    )
    assert slab.shape == (_N_PARAM_ROWS, HIDDEN)
    return slab


def _policy_call(state2d, params):
    B = state2d.shape[0]
    return pl.pallas_call(
        policy_kernel,
        out_shape=jax.ShapeDtypeStruct((B, ACTION_DIM), jnp.float32),
        in_specs=[
            pl.BlockSpec(memory_space=pltpu.MemorySpace.VMEM),   # state (whole block)
            pl.BlockSpec(memory_space=pltpu.MemorySpace.VMEM),   # packed params
        ],
        out_specs=pl.BlockSpec(memory_space=pltpu.MemorySpace.VMEM),
    )(state2d, params)


@jax.jit
def policy_forward(state, params):
    """state: [OBS_DIM] or [B, OBS_DIM] f32, params: packed slab from pack_params.

    Returns action probabilities: [ACTION_DIM] for a single state (matching
    torch softmax(dim=0) on a 1-D input) or [B, ACTION_DIM] for a batch
    (softmax over the action axis per row).
    """
    single = state.ndim == 1
    s2d = state.reshape(1, OBS_DIM) if single else state
    out = _policy_call(s2d.astype(jnp.float32), params)
    return out[0] if single else out


def init_params(key):
    """Deterministic PyTorch-Linear-style init (uniform +-1/sqrt(fan_in))."""
    k1, k2, k3, k4 = jax.random.split(key, 4)
    bound1 = 1.0 / jnp.sqrt(OBS_DIM)
    bound2 = 1.0 / jnp.sqrt(HIDDEN)
    w1 = jax.random.uniform(k1, (OBS_DIM, HIDDEN), jnp.float32, -bound1, bound1)
    b1 = jax.random.uniform(k2, (HIDDEN,), jnp.float32, -bound1, bound1)
    w2 = jax.random.uniform(k3, (HIDDEN, ACTION_DIM), jnp.float32, -bound2, bound2)
    b2 = jax.random.uniform(k4, (ACTION_DIM,), jnp.float32, -bound2, bound2)
    return w1, b1, w2, b2


def policy_forward_ref(state, w1, b1, w2, b2):
    h = jnp.maximum(state @ w1 + b1, 0.0)
    logits = h @ w2 + b2
    return jax.nn.softmax(logits, axis=-1)   # == torch softmax(dim=0) for 1-D state


# TODO(synk): select_action's Categorical sampling, calculate_loss, and the
# optimizer step are host-side RL bookkeeping, not part of the forward pass;
# they are intentionally not implemented as Pallas kernels.

if __name__ == "__main__":
    key = jax.random.PRNGKey(0)
    pkey, skey = jax.random.split(key)
    w1, b1, w2, b2 = init_params(pkey)
    params = pack_params(w1, b1, w2, b2)

    # Batched path: B = 8 fills the vreg sublane dimension.
    B = 8
    states = jax.random.normal(skey, (B, OBS_DIM), jnp.float32)

    probs = policy_forward(states, params)
    probs = jax.block_until_ready(probs)
    ref = policy_forward_ref(states, w1, b1, w2, b2)
    assert probs.shape == (B, ACTION_DIM)
    assert jnp.allclose(probs, ref, atol=1e-5, rtol=1e-5)
    assert jnp.allclose(jnp.sum(probs, axis=-1), jnp.ones((B,)), atol=1e-5)

    # Single-state path (original select_action semantics, softmax dim=0 on 1-D).
    p1 = policy_forward(states[0], params)
    p1 = jax.block_until_ready(p1)
    ref1 = policy_forward_ref(states[0], w1, b1, w2, b2)
    assert p1.shape == (ACTION_DIM,)
    assert jnp.allclose(p1, ref1, atol=1e-5, rtol=1e-5)
    assert jnp.allclose(jnp.sum(p1), 1.0, atol=1e-5)

    print("KERNEL_OK")
</pallas_src>

<mosaic_0001>
module attributes {stable_mosaic.version = 11 : i64} {
  func.func @policy_kernel(%arg0: memref<8x4xf32, #tpu.memory_space<vmem>>, %arg1: memref<8x128xf32, #tpu.memory_space<vmem>>, %arg2: memref<8x2xf32, #tpu.memory_space<vmem>>) attributes {dimension_semantics = [], scalar_prefetch = 0 : i64, scratch_operands = 0 : i64, tpu.core_type = #tpu.core_type<tc>} {
    %c0 = arith.constant 0 : index
    %c0_0 = arith.constant 0 : index
    %0 = vector.load %arg0[%c0, %c0_0] : memref<8x4xf32, #tpu.memory_space<vmem>>, vector<8x4xf32>
    %c0_1 = arith.constant 0 : index
    %c0_2 = arith.constant 0 : index
    %1 = vector.load %arg1[%c0_1, %c0_2] : memref<8x128xf32, #tpu.memory_space<vmem>>, vector<8x128xf32>
    %2 = vector.extract_strided_slice %1 {offsets = [4, 0], sizes = [1, 128], strides = [1, 1]} : vector<8x128xf32> to vector<1x128xf32>
    %3 = vector.extract_strided_slice %0 {offsets = [0, 0], sizes = [8, 1], strides = [1, 1]} : vector<8x4xf32> to vector<8x1xf32>
    %4 = vector.extract_strided_slice %1 {offsets = [0, 0], sizes = [1, 128], strides = [1, 1]} : vector<8x128xf32> to vector<1x128xf32>
    %5 = vector.broadcast %3 : vector<8x1xf32> to vector<8x128xf32>
    %6 = vector.broadcast %4 : vector<1x128xf32> to vector<8x128xf32>
    %7 = arith.mulf %5, %6 : vector<8x128xf32>
    %8 = vector.broadcast %2 : vector<1x128xf32> to vector<8x128xf32>
    %9 = arith.addf %8, %7 : vector<8x128xf32>
    %10 = vector.extract_strided_slice %0 {offsets = [0, 1], sizes = [8, 1], strides = [1, 1]} : vector<8x4xf32> to vector<8x1xf32>
    %11 = vector.extract_strided_slice %1 {offsets = [1, 0], sizes = [1, 128], strides = [1, 1]} : vector<8x128xf32> to vector<1x128xf32>
    %12 = vector.broadcast %10 : vector<8x1xf32> to vector<8x128xf32>
    %13 = vector.broadcast %11 : vector<1x128xf32> to vector<8x128xf32>
    %14 = arith.mulf %12, %13 : vector<8x128xf32>
    %15 = arith.addf %9, %14 : vector<8x128xf32>
    %16 = vector.extract_strided_slice %0 {offsets = [0, 2], sizes = [8, 1], strides = [1, 1]} : vector<8x4xf32> to vector<8x1xf32>
    %17 = vector.extract_strided_slice %1 {offsets = [2, 0], sizes = [1, 128], strides = [1, 1]} : vector<8x128xf32> to vector<1x128xf32>
    %18 = vector.broadcast %16 : vector<8x1xf32> to vector<8x128xf32>
    %19 = vector.broadcast %17 : vector<1x128xf32> to vector<8x128xf32>
    %20 = arith.mulf %18, %19 : vector<8x128xf32>
    %21 = arith.addf %15, %20 : vector<8x128xf32>
    %22 = vector.extract_strided_slice %0 {offsets = [0, 3], sizes = [8, 1], strides = [1, 1]} : vector<8x4xf32> to vector<8x1xf32>
    %23 = vector.extract_strided_slice %1 {offsets = [3, 0], sizes = [1, 128], strides = [1, 1]} : vector<8x128xf32> to vector<1x128xf32>
    %24 = vector.broadcast %22 : vector<8x1xf32> to vector<8x128xf32>
    %25 = vector.broadcast %23 : vector<1x128xf32> to vector<8x128xf32>
    %26 = arith.mulf %24, %25 : vector<8x128xf32>
    %27 = arith.addf %21, %26 : vector<8x128xf32>
    %cst = arith.constant 0.000000e+00 : f32
    %28 = vector.broadcast %cst : f32 to vector<8x128xf32>
    %29 = arith.maximumf %27, %28 : vector<8x128xf32>
    %30 = vector.extract_strided_slice %1 {offsets = [5, 0], sizes = [1, 128], strides = [1, 1]} : vector<8x128xf32> to vector<1x128xf32>
    %31 = vector.broadcast %30 : vector<1x128xf32> to vector<8x128xf32>
    %32 = arith.mulf %29, %31 : vector<8x128xf32>
    %cst_3 = arith.constant dense<0.000000e+00> : vector<8xf32>
    %33 = vector.multi_reduction <add>, %32, %cst_3 [1] : vector<8x128xf32> to vector<8xf32>
    %34 = vector.shape_cast %33 : vector<8xf32> to vector<8x1xf32>
    %35 = vector.extract_strided_slice %1 {offsets = [6, 0], sizes = [1, 128], strides = [1, 1]} : vector<8x128xf32> to vector<1x128xf32>
    %36 = vector.broadcast %35 : vector<1x128xf32> to vector<8x128xf32>
    %37 = arith.mulf %29, %36 : vector<8x128xf32>
    %cst_4 = arith.constant dense<0.000000e+00> : vector<8xf32>
    %38 = vector.multi_reduction <add>, %37, %cst_4 [1] : vector<8x128xf32> to vector<8xf32>
    %39 = vector.shape_cast %38 : vector<8xf32> to vector<8x1xf32>
    %40 = tpu.concatenate %34, %39 in 1 : vector<8x1xf32>, vector<8x1xf32> -> vector<8x2xf32>
    %41 = vector.extract_strided_slice %1 {offsets = [7, 0], sizes = [1, 2], strides = [1, 1]} : vector<8x128xf32> to vector<1x2xf32>
    %42 = vector.broadcast %41 : vector<1x2xf32> to vector<8x2xf32>
    %43 = arith.addf %40, %42 : vector<8x2xf32>
    %cst_5 = arith.constant dense<0xFF800000> : vector<8xf32>
    %44 = vector.multi_reduction <maximumf>, %43, %cst_5 [1] : vector<8x2xf32> to vector<8xf32>
    %45 = vector.shape_cast %44 : vector<8xf32> to vector<8x1xf32>
    %46 = vector.broadcast %45 : vector<8x1xf32> to vector<8x2xf32>
    %47 = arith.subf %43, %46 : vector<8x2xf32>
    %48 = math.exp %47 : vector<8x2xf32>
    %cst_6 = arith.constant dense<0.000000e+00> : vector<8xf32>
    %49 = vector.multi_reduction <add>, %48, %cst_6 [1] : vector<8x2xf32> to vector<8xf32>
    %50 = vector.shape_cast %49 : vector<8xf32> to vector<8x1xf32>
    %51 = tpu.reciprocal %50 : vector<8x1xf32> -> vector<8x1xf32>
    %52 = vector.broadcast %51 : vector<8x1xf32> to vector<8x2xf32>
    %53 = arith.mulf %48, %52 : vector<8x2xf32>
    %c0_7 = arith.constant 0 : index
    %c0_8 = arith.constant 0 : index
    %54 = vector.load %arg2[%c0_7, %c0_8] : memref<8x2xf32, #tpu.memory_space<vmem>>, vector<8x2xf32>
    tpu.vector_store %arg2[%c0_7, %c0_8], %53 {strides = array<i32>} : memref<8x2xf32, #tpu.memory_space<vmem>>, vector<8x2xf32>,
    return
  }
}

</mosaic_0001>

<bundles_post_ra>
// kernel: policy_forward.1
= control target key start
LH: loop header
LB: loop body
LE: loop exit
PB: predicated region body
PF: predicated region fallthrough
CT: control target
= control target key end

     0   :  { %v99_v0 = vmov 0   ;;  %v100_v2 = vmov 2   ;;  %v101_v3 = vmov 1   ;;  %v102_v4 = vmov 3   ;;  %s130_s0 = inlined_call_operand.vmem [shape: f32[8,4], index: 0, kind: input, shape index: {}]   ;;  %s131_s1 = inlined_call_operand.vmem [shape: f32[8,128], index: 1, kind: input, shape index: {}]   ;;  %s132_s2 = inlined_call_operand.vmem [shape: f32[8,2], index: 2, kind: output, shape index: {}]  }
   0x1   :  { %90 = vset.pattern.permute.xlu0 %v99_v0  ;;  %v11_v1 = vld [vmem:[%s130_s0] sm:$0xff]  ;;  %92 = vset.pattern.permute.xlu1 %v100_v2  ;;  %vm52_vm0 = vcmask 7168   ;;  %vm56_vm1 = vcmask 15360  }
   0x2   :  { %15 = vperm.xlu0 %90, %v11_v1   ;;  %30 = vperm.xlu1 %92, %v11_v1   ;;  %v12_v5 = vld [vmem:[%s131_s1] sm:$0xff] }
   0x3   :  { %v18_v8 = vperm.slane %v12_v5, 0  ;;  %v20_v9 = vperm.slane %v12_v5, 4  ;;  %v26_v11 = vperm.slane %v12_v5, 1  ;;  %v33_v12 = vperm.slane %v12_v5, 2 }
   0x4   :  { %v40_v13 = vperm.slane %v12_v5, 3  ;;  %v44_v23 = vperm.slane %v12_v5, 5  ;;  %v48_v26 = vperm.slane %v12_v5, 6  ;;  %v54_v29 = vperm.slane %v12_v5, 7 }
   0xa   :  { %91 = vset.pattern.permute.xlu0 %v101_v3  ;;  %93 = vset.pattern.permute.xlu1 %v102_v4 }
   0xb   :  { %23 = vperm.xlu0 %91, %v11_v1   ;;  %37 = vperm.xlu1 %93, %v11_v1  }
  0x13   :  { %94 = vset.pattern.permute.xlu0 %v102_v4 }
  0x74   :  { %v16_v6 = vpop.permute.xlu0 %15  ;;  %v31_v7 = vpop.permute.xlu1 %30 }
  0x75   :  { %v19_v10 = vmul.f32 %v18_v8, %v16_v6  ;;  %v34_v18 = vmul.f32 %v33_v12, %v31_v7 }
  0x77   :  { %v21_v16 = vadd.f32 %v20_v9, %v19_v10 }
  0x7d   :  { %v24_v14 = vpop.permute.xlu0 %23  ;;  %v38_v15 = vpop.permute.xlu1 %37 }
  0x7e   :  { %v27_v17 = vmul.f32 %v26_v11, %v24_v14  ;;  %v41_v20 = vmul.f32 %v40_v13, %v38_v15 }
  0x80   :  { %v28_v19 = vadd.f32 %v27_v17, %v21_v16 }
  0x82   :  { %v35_v21 = vadd.f32 %v34_v18, %v28_v19 }
  0x84   :  { %v42_v22 = vadd.f32 %v41_v20, %v35_v21 }
  0x86   :  { %v43_v24 = vmax.f32 %v42_v22, 0.0 }
  0x88   :  { %v45_v25 = vmul.f32 %v44_v23, %v43_v24  ;;  %v49_v27 = vmul.f32 %v48_v26, %v43_v24 }
  0x8a   :  { %46 = vadd.xlane.f32.xlu2 %v45_v25 }
  0x92   :  { %50 = vadd.xlane.f32.xlu2 %v49_v27 }
  0xfd   :  { %v47_v28 = vpop.xlane.xlu2 %46 }
 0x105   :  { %v51_v30 = vpop.xlane.xlu2 %50 }
 0x106   :  { %v53_v31 = vsel %vm52_vm0, %v47_v28, %v51_v30 }
 0x107   :  { %v55_v32 = vadd.f32 %v54_v29, %v53_v31 }
 0x109   :  { %v57_v33 = vsel %vm56_vm1, %v55_v32, -inf }
 0x10a   :  { %58 = vmax.xlane.f32.xlu1 %v57_v33 }
 0x17d   :  { %v59_v34 = vpop.xlane.xlu1 %58 }
 0x17e   :  { %v60_v35 = vsub.f32 %v55_v32, %v59_v34 }
 0x180   :  { %v61_v36 = vmul.f32 1.442695, %v60_v35 }
 0x182   :  { %95 = vpow2.f32 %v61_v36 }
 0x188   :  { %v96_v37 = vpop.eup %95 }
 0x189   :  { %v63_v38 = vsel %vm56_vm1, %v96_v37, 0.0 }
 0x18a   :  { %64 = vadd.xlane.f32.xlu2 %v63_v38 }
 0x1fd   :  { %v65_v39 = vpop.xlane.xlu2 %64 }
 0x1fe   :  { %97 = vrcp.f32 %v65_v39  ;;  %v77_v43 = vand.u32 2147483648, %v65_v39  ;;  %v75_v45 = vand.u32 2147483647, %v65_v39  ;;  %vm71_vm3 = vweird.f32 %v65_v39 }
 0x200   :  { %v78_v47 = vor.u32 1.1754944e-38, %v77_v43  ;;  %vm76_vm5 = vcmp.eq.f32.partialorder %v75_v45, 8.507059e+37 }
 0x204   :  { %v98_v40 = vpop.eup %97 }
 0x205   :  { %v67_v41 = vmul.f32 %v98_v40, %v65_v39  ;;  %vm72_vm2 = vweird.f32 %v98_v40 }
 0x206   :  { %vm73_vm4 = vmor %vm71_vm3, %vm72_vm2 }
 0x207   :  { %v68_v42 = vsub.f32 1.0, %v67_v41 }
 0x209   :  { %v69_v44 = vmul.f32 %v98_v40, %v68_v42 }
 0x20b   :  { %v70_v46 = vadd.f32 %v98_v40, %v69_v44 }
 0x20d   :  { %v74_v48 = vsel %vm73_vm4, %v98_v40, %v70_v46 }
 0x20e   :  { %v79_v49 = vsel %vm76_vm5, %v78_v47, %v74_v48 }
 0x20f   :  { %v80_v50 = vmul.f32 %v96_v37, %v79_v49 }
 0x211   :  { %81 = vst.msk [vmem:[%s132_s2] sm:$0xff] %vm56_vm1, %v80_v50 }

</bundles_post_ra>
